<compile_context>
chip_gen: v7x
topology: tpu7x:2x2x1
jax: 0.10.0
libtpu: 0.0.40
codegen_flags: <defaults>
</compile_context>

<pallas_src>
import functools

import jax
import jax.numpy as jnp
from jax.experimental import pallas as pl
from jax.experimental.pallas import tpu as pltpu


def _round_up(n, m):
    return ((n + m - 1) // m) * m


def _mamba_cell_kernel(thr_ref, xh_ref, w1_ref, b1_ref, w2_ref, b2_ref,
                       out_ref, hid_ref):
    """One cell step, everything resident in VMEM.

    hidden = tanh([x, h] @ W1c + b1)
    hidden = where(hidden > threshold, hidden, 0)
    output = hidden @ W2 + b2
    """
    thr = thr_ref[0]                                     # SMEM scalar

    # Single fused-K matmul on the MXU, f32 accumulation.
    pre = jnp.dot(xh_ref[...].astype(w1_ref.dtype), w1_ref[...],
                  preferred_element_type=jnp.float32) + b1_ref[...]

    hid = jnp.tanh(pre)                                  # EUP, f32
    hid = jnp.where(hid > thr, hid, 0.0)                 # single VPU select

    out = jnp.dot(hid.astype(w2_ref.dtype), w2_ref[...],
                  preferred_element_type=jnp.float32) + b2_ref[...]

    out_ref[...] = out
    hid_ref[...] = hid


def prepare_params(w1, b1, w2, b2, *, param_dtype=jnp.float32):
    """One-time parameter prep (hoisted out of the per-step call).

    w1: (H, I+H), b1: (H,), w2: (O, H), b2: (O,)  -- PyTorch Linear layout.
    Returns padded, pre-transposed tensors:
      w1c: (Kp, Hp)   b1p: (1, Hp)   w2p: (Hp, Op)   b2p: (1, Op)
    Padding is zero-filled, so padded lanes contribute exactly 0.
    For v6e/v7x, pass param_dtype=jnp.bfloat16 to halve resident weight bytes
    and use bf16 MXU operands (accumulation stays f32).
    """
    H, K = w1.shape                      # K = I + H
    O = w2.shape[0]
    Kp, Hp, Op = _round_up(K, 128), _round_up(H, 128), _round_up(O, 128)

    w1c = jnp.zeros((Kp, Hp), param_dtype).at[:K, :H].set(
        jnp.asarray(w1, jnp.float32).T.astype(param_dtype))
    b1p = jnp.zeros((1, Hp), jnp.float32).at[:, :H].set(
        jnp.asarray(b1, jnp.float32))
    w2p = jnp.zeros((Hp, Op), param_dtype).at[:H, :O].set(
        jnp.asarray(w2, jnp.float32).T.astype(param_dtype))
    b2p = jnp.zeros((1, Op), jnp.float32).at[:, :O].set(
        jnp.asarray(b2, jnp.float32))
    return w1c, b1p, w2p, b2p


@functools.partial(jax.jit, static_argnames=("output_size",))
def mamba_cell(x, h, w1c, b1p, w2p, b2p, threshold, *, output_size):
    """Single forward step: (x (B,I), h (B,H)) -> (out (B,O), hidden (B,H))."""
    B, I = x.shape
    H = h.shape[1]
    O = output_size
    Kp, Hp = w1c.shape
    Op = w2p.shape[1]
    Bp = _round_up(B, 8)

    # Fuse the torch.cat by writing x and h into adjacent lanes of one buffer,
    # padded to an (8,128)-aligned slab.
    xh = jnp.zeros((Bp, Kp), jnp.float32)
    xh = xh.at[:B, :I].set(x.astype(jnp.float32))
    xh = xh.at[:B, I:I + H].set(h.astype(jnp.float32))

    thr = jnp.asarray(threshold, jnp.float32).reshape((1,))

    vmem = pl.BlockSpec(memory_space=pltpu.MemorySpace.VMEM)
    smem = pl.BlockSpec(memory_space=pltpu.MemorySpace.SMEM)

    itemsize = jnp.dtype(w1c.dtype).itemsize
    cost = pl.CostEstimate(
        flops=2 * Bp * Kp * Hp + 2 * Bp * Hp * Op,
        transcendentals=Bp * Hp,
        bytes_accessed=(4 * (Bp * Kp + Hp + Op + Bp * Op + Bp * Hp)
                        + itemsize * (Kp * Hp + Hp * Op)),
    )

    out_p, hid_p = pl.pallas_call(
        _mamba_cell_kernel,
        out_shape=(jax.ShapeDtypeStruct((Bp, Op), jnp.float32),
                   jax.ShapeDtypeStruct((Bp, Hp), jnp.float32)),
        in_specs=[smem, vmem, vmem, vmem, vmem, vmem],
        out_specs=(vmem, vmem),
        cost_estimate=cost,
    )(thr, xh, w1c, b1p, w2p, b2p)

    # Strip padding (lane-dense inside the kernel, exact shapes outside).
    return out_p[:B, :O], hid_p[:B, :H]
    # TODO(synk): for sequence workloads, fuse the time loop into one kernel
    # (time on an "arbitrary" grid axis, h carried in VMEM scratch); the
    # module itself only defines a single-step forward, which is kept here.


def _reference(x, h, w1, b1, w2, b2, threshold):
    combined = jnp.concatenate([x, h], axis=1)
    hid = jnp.tanh(combined @ w1.T + b1)
    hid = hid * (hid > threshold).astype(jnp.float32)
    out = hid @ w2.T + b2
    return out, hid


if __name__ == "__main__":
    batch_size = 2
    input_size = 16
    hidden_size = 32
    output_size = 8
    threshold = 0.0

    key = jax.random.PRNGKey(0)
    k_x, k_h, k_w1, k_b1, k_w2, k_b2 = jax.random.split(key, 6)

    bound1 = 1.0 / float(jnp.sqrt(jnp.float32(input_size + hidden_size)))
    bound2 = 1.0 / float(jnp.sqrt(jnp.float32(hidden_size)))
    w1 = jax.random.uniform(k_w1, (hidden_size, input_size + hidden_size),
                            jnp.float32, -bound1, bound1)
    b1 = jax.random.uniform(k_b1, (hidden_size,), jnp.float32, -bound1, bound1)
    w2 = jax.random.uniform(k_w2, (output_size, hidden_size),
                            jnp.float32, -bound2, bound2)
    b2 = jax.random.uniform(k_b2, (output_size,), jnp.float32, -bound2, bound2)

    x = jax.random.normal(k_x, (batch_size, input_size), jnp.float32)
    h0 = jax.random.uniform(k_h, (batch_size, hidden_size), jnp.float32)

    # One-time weight prep (f32 here so the f32 reference tolerance holds;
    # use param_dtype=jnp.bfloat16 for v6e/v7x MXU-rate weights at scale).
    params = prepare_params(w1, b1, w2, b2, param_dtype=jnp.float32)

    out, hid = mamba_cell(x, h0, *params, threshold, output_size=output_size)
    jax.block_until_ready((out, hid))

    out_ref, hid_ref = _reference(x, h0, w1, b1, w2, b2, threshold)
    assert out.shape == (batch_size, output_size)
    assert hid.shape == (batch_size, hidden_size)
    assert jnp.allclose(out, out_ref, atol=1e-5, rtol=1e-5)
    assert jnp.allclose(hid, hid_ref, atol=1e-5, rtol=1e-5)

    print("KERNEL_OK")
</pallas_src>

<mosaic_0001>
module attributes {stable_mosaic.version = 11 : i64} {
  func.func @_mamba_cell_kernel(%arg0: memref<1xf32, #tpu.memory_space<smem>>, %arg1: memref<8x128xf32, #tpu.memory_space<vmem>>, %arg2: memref<128x128xf32, #tpu.memory_space<vmem>>, %arg3: memref<1x128xf32, #tpu.memory_space<vmem>>, %arg4: memref<128x128xf32, #tpu.memory_space<vmem>>, %arg5: memref<1x128xf32, #tpu.memory_space<vmem>>, %arg6: memref<8x128xf32, #tpu.memory_space<vmem>>, %arg7: memref<8x128xf32, #tpu.memory_space<vmem>>) attributes {dimension_semantics = [], scalar_prefetch = 0 : i64, scratch_operands = 0 : i64, tpu.core_type = #tpu.core_type<tc>} {
    %c0 = arith.constant 0 : index
    %0 = memref.load %arg0[%c0] : memref<1xf32, #tpu.memory_space<smem>>
    %c0_0 = arith.constant 0 : index
    %c0_1 = arith.constant 0 : index
    %1 = vector.load %arg1[%c0_0, %c0_1] : memref<8x128xf32, #tpu.memory_space<vmem>>, vector<8x128xf32>
    %c0_2 = arith.constant 0 : index
    %c0_3 = arith.constant 0 : index
    %2 = vector.load %arg2[%c0_2, %c0_3] : memref<128x128xf32, #tpu.memory_space<vmem>>, vector<128x128xf32>
    %cst = arith.constant dense<0.000000e+00> : vector<8x128xf32>
    %3 = tpu.matmul %1, %2, %cst {dimension_numbers = #tpu.dot_dimension_numbers<[1], [0], [0], [1], [0, 0, 1, 1], [], []>} : vector<8x128xf32>, vector<128x128xf32>, vector<8x128xf32> -> vector<8x128xf32>
    %c0_4 = arith.constant 0 : index
    %c0_5 = arith.constant 0 : index
    %4 = vector.load %arg3[%c0_4, %c0_5] : memref<1x128xf32, #tpu.memory_space<vmem>>, vector<1x128xf32>
    %5 = vector.broadcast %4 : vector<1x128xf32> to vector<8x128xf32>
    %6 = arith.addf %3, %5 : vector<8x128xf32>
    %7 = math.tanh %6 : vector<8x128xf32>
    %8 = vector.broadcast %0 : f32 to vector<8x128xf32>
    %9 = arith.cmpf ogt, %7, %8 : vector<8x128xf32>
    %cst_6 = arith.constant 0.000000e+00 : f32
    %10 = vector.broadcast %cst_6 : f32 to vector<8x128xf32>
    %11 = arith.select %9, %7, %10 : vector<8x128xi1>, vector<8x128xf32>
    %c0_7 = arith.constant 0 : index
    %c0_8 = arith.constant 0 : index
    %12 = vector.load %arg4[%c0_7, %c0_8] : memref<128x128xf32, #tpu.memory_space<vmem>>, vector<128x128xf32>
    %cst_9 = arith.constant dense<0.000000e+00> : vector<8x128xf32>
    %13 = tpu.matmul %11, %12, %cst_9 {dimension_numbers = #tpu.dot_dimension_numbers<[1], [0], [0], [1], [0, 0, 1, 1], [], []>} : vector<8x128xf32>, vector<128x128xf32>, vector<8x128xf32> -> vector<8x128xf32>
    %c0_10 = arith.constant 0 : index
    %c0_11 = arith.constant 0 : index
    %14 = vector.load %arg5[%c0_10, %c0_11] : memref<1x128xf32, #tpu.memory_space<vmem>>, vector<1x128xf32>
    %15 = vector.broadcast %14 : vector<1x128xf32> to vector<8x128xf32>
    %16 = arith.addf %13, %15 : vector<8x128xf32>
    %c0_12 = arith.constant 0 : index
    %c0_13 = arith.constant 0 : index
    %17 = vector.load %arg6[%c0_12, %c0_13] : memref<8x128xf32, #tpu.memory_space<vmem>>, vector<8x128xf32>
    tpu.vector_store %arg6[%c0_12, %c0_13], %16 {strides = array<i32>} : memref<8x128xf32, #tpu.memory_space<vmem>>, vector<8x128xf32>,
    %c0_14 = arith.constant 0 : index
    %c0_15 = arith.constant 0 : index
    %18 = vector.load %arg7[%c0_14, %c0_15] : memref<8x128xf32, #tpu.memory_space<vmem>>, vector<8x128xf32>
    tpu.vector_store %arg7[%c0_14, %c0_15], %11 {strides = array<i32>} : memref<8x128xf32, #tpu.memory_space<vmem>>, vector<8x128xf32>,
    return
  }
}

</mosaic_0001>

<bundles_post_ra>
// kernel: mamba_cell.1
= control target key start
LH: loop header
LB: loop body
LE: loop exit
PB: predicated region body
PF: predicated region fallthrough
CT: control target
= control target key end

     0   :  { %14 = vsyncpa [#allocation4], 0  ;;  %s575_s0 = inlined_call_operand.<no memory space> [shape: f32[1], index: 0, kind: input, shape index: {}]   ;;  %s576_s1 = inlined_call_operand.vmem [shape: f32[8,128], index: 1, kind: input, shape index: {}]   ;;  %s577_s2 = inlined_call_operand.hbm [shape: f32[128,128], index: 2, kind: input, shape index: {}]   ;;  %s578_s3 = inlined_call_operand.vmem [shape: f32[1,128], index: 3, kind: input, shape index: {}]   ;;  %s579_s4 = inlined_call_operand.hbm [shape: f32[128,128], index: 4, kind: input, shape index: {}]   ;;  %s580_s5 = inlined_call_operand.vmem [shape: f32[1,128], index: 5, kind: input, shape index: {}]   ;;  %s581_s6 = inlined_call_operand.vmem [shape: f32[8,128], index: 6, kind: output, shape index: {0}]   ;;  %s582_s7 = inlined_call_operand.vmem [shape: f32[8,128], index: 7, kind: output, shape index: {1}]  }
   0x1   :  { %15 = vsyncpa [#allocation6], 0  ;;  %s470_s24 = smov [#allocation3]   ;;  %s422_s28 = scalar_lea.hbm %s577_s2, 2048 }
   0x2   :  { %s25_s25 = sshll.u32 %s470_s24, 4  ;;  %p423_p0 = scmp.ne.s32.totalorder %s577_s2, %s422_s28  ;;  %s26_s25 = int_to_ptr.vmem [resolvable:$true] %s25_s25 }
   0x3   :  { %p426_p1 = scmp.lt.u32.totalorder %s422_s28, %s577_s2 }
   0x5   :  { %p428_p2 = pnand %p426_p1, %p423_p0 }
   0x7   :  { %431 = shalt.err (!%p428_p2)
}
   0x8   :  { %s432_s10 = scalar_lea.vmem %s26_s25, 2048  ;;  %p437_p4 = scmp.lt.s32.totalorder %s26_s25, %s26_s25 }
   0x9   :  { %p433_p3 = scmp.ne.s32.totalorder %s26_s25, %s432_s10  ;;  %p438_p5 = scmp.lt.s32.totalorder %s432_s10, %s432_s10 }
   0xb   :  { %p439_p6 = por %p438_p5, %p437_p4 }
   0xd   :  { %p440_p7 = pnand %p439_p6, %p433_p3 }
   0xf   :  { %443 = shalt.err (!%p440_p7)
}
  0x10   :  { %s471_s11 = smov 128   ;;  %s472_s12 = smov 8  }
  0x11   :  { %31 = dma.hbm_to_vmem [thread:$0]  %s577_s2, 2048, %s26_s25, [#allocation4], %s471_s11, %s471_s11, %s472_s12  }
  0x12   :  { %s473_s15 = smov [#allocation5]   ;;  %s444_s19 = scalar_lea.hbm %s579_s4, 2048 }
  0x13   :  { %s39_s16 = sshll.u32 %s473_s15, 4  ;;  %p445_p8 = scmp.ne.s32.totalorder %s579_s4, %s444_s19  ;;  %s40_s16 = int_to_ptr.vmem [resolvable:$true] %s39_s16 }
  0x14   :  { %p448_p9 = scmp.lt.u32.totalorder %s444_s19, %s579_s4 }
  0x16   :  { %p450_p10 = pnand %p448_p9, %p445_p8 }
  0x18   :  { %453 = shalt.err (!%p450_p10)
}
  0x19   :  { %s454_s24 = scalar_lea.vmem %s40_s16, 2048  ;;  %p459_p12 = scmp.lt.s32.totalorder %s40_s16, %s40_s16 }
  0x1a   :  { %p455_p11 = scmp.ne.s32.totalorder %s40_s16, %s454_s24  ;;  %p460_p13 = scmp.lt.s32.totalorder %s454_s24, %s454_s24 }
  0x1c   :  { %p461_p0 = por %p460_p13, %p459_p12 }
  0x1e   :  { %p462_p1 = pnand %p461_p0, %p455_p11 }
  0x20   :  { %465 = shalt.err (!%p462_p1)
}
  0x21   :  { %45 = dma.hbm_to_vmem [thread:$0]  %s579_s4, 2048, %s40_s16, [#allocation6], %s471_s11, %s471_s11, %s472_s12  }
  0x22   :  { %466 = dma.done.wait [#allocation4], 2048  }
  0x23   :  { %467 = vsyncadd [#allocation4], 4294965248 }
  0x24   :  { %468 = dma.done.wait [#allocation6], 2048  }
  0x25   :  { %469 = vsyncadd [#allocation6], 4294965248  ;;  %v474_v0 = vmov 0.0|0.0   ;;  %vm475_vm0 = vmmov 0   ;;  %v476_v1 = vmov 0.0   ;;  %v56_v2 = vld [vmem:[#allocation3] sm:$0xff]  ;;  %v150_v55 = vstv %s575_s0 }
  0x26   :  { %365 = vmatprep.subr.bf16.mxu0 %v474_v0  ;;  %327 = vmatprep.mubr.msk.f32.mxu0 %vm475_vm0, %v476_v1  ;;  %v57_v3 = vld [vmem:[#allocation3 + $0x8] sm:$0xff]  ;;  %v58_v4 = vld [vmem:[#allocation3 + $0x10] sm:$0xff]  ;;  %v59_v6 = vld [vmem:[#allocation3 + $0x18] sm:$0xff] }
  0x27   :  { %389 = vmatprep.subr.bf16.mxu1 %v474_v0  ;;  %362 = vmatprep.mubr.msk.f32.mxu1 %vm475_vm0, %v476_v1  ;;  %v366_v5 = vpack.c.bf16 %v57_v3, %v56_v2  ;;  %v369_v7 = vpack.c.bf16 %v59_v6, %v58_v4  ;;  %v60_v8 = vld [vmem:[#allocation3 + $0x20] sm:$0xff]  ;;  %v61_v9 = vld [vmem:[#allocation3 + $0x28] sm:$0xff]  ;;  %v155_v12 = vld [vmem:[#allocation5 + $0x10] sm:$0xff] }
  0x28   :  { %v153_v10 = vld [vmem:[#allocation5] sm:$0xff]  ;;  %v154_v11 = vld [vmem:[#allocation5 + $0x8] sm:$0xff]  ;;  %v156_v13 = vld [vmem:[#allocation5 + $0x18] sm:$0xff]  ;;  %v372_v14 = vpack.c.bf16 %v61_v9, %v60_v8 }
  0x29   :  { %367 = vmatpush3.bf16.msra.mxu0 %v366_v5  ;;  %v390_v15 = vpack.c.bf16 %v154_v11, %v153_v10  ;;  %v62_v16 = vld [vmem:[#allocation3 + $0x30] sm:$0xff]  ;;  %v63_v17 = vld [vmem:[#allocation3 + $0x38] sm:$0xff]  ;;  %v393_v18 = vpack.c.bf16 %v156_v13, %v155_v12  ;;  %v157_v19 = vld [vmem:[#allocation5 + $0x20] sm:$0xff] }
  0x2a   :  { %368 = vmatprep.subr.bf16.mxu0 %v474_v0  ;;  %v158_v20 = vld [vmem:[#allocation5 + $0x28] sm:$0xff]  ;;  %v375_v21 = vpack.c.bf16 %v63_v17, %v62_v16  ;;  %v64_v22 = vld [vmem:[#allocation3 + $0x40] sm:$0xff]  ;;  %v159_v25 = vld [vmem:[#allocation5 + $0x30] sm:$0xff] }
  0x2b   :  { %391 = vmatpush3.bf16.msra.mxu1 %v390_v15  ;;  %v65_v23 = vld [vmem:[#allocation3 + $0x48] sm:$0xff]  ;;  %v396_v24 = vpack.c.bf16 %v158_v20, %v157_v19  ;;  %v160_v26 = vld [vmem:[#allocation5 + $0x38] sm:$0xff]  ;;  %v66_v28 = vld [vmem:[#allocation3 + $0x50] sm:$0xff] }
  0x2c   :  { %392 = vmatprep.subr.bf16.mxu1 %v474_v0  ;;  %v378_v27 = vpack.c.bf16 %v65_v23, %v64_v22  ;;  %v67_v29 = vld [vmem:[#allocation3 + $0x58] sm:$0xff]  ;;  %v399_v30 = vpack.c.bf16 %v160_v26, %v159_v25  ;;  %v68_v32 = vld [vmem:[#allocation3 + $0x60] sm:$0xff]  ;;  %v69_v33 = vld [vmem:[#allocation3 + $0x68] sm:$0xff] }
  0x2d   :  { %370 = vmatpush3.bf16.msra.mxu0 %v369_v7  ;;  %v381_v31 = vpack.c.bf16 %v67_v29, %v66_v28  ;;  %v384_v34 = vpack.c.bf16 %v69_v33, %v68_v32  ;;  %v70_v35 = vld [vmem:[#allocation3 + $0x70] sm:$0xff]  ;;  %v71_v36 = vld [vmem:[#allocation3 + $0x78] sm:$0xff]  ;;  %v55_v38 = vld [vmem:[%s576_s1] sm:$0xff] }
  0x2e   :  { %371 = vmatprep.subr.bf16.mxu0 %v474_v0  ;;  %v387_v37 = vpack.c.bf16 %v71_v36, %v70_v35  ;;  %v161_v39 = vld [vmem:[#allocation5 + $0x40] sm:$0xff]  ;;  %v162_v40 = vld [vmem:[#allocation5 + $0x48] sm:$0xff]  ;;  %v163_v42 = vld [vmem:[#allocation5 + $0x50] sm:$0xff] }
  0x2f   :  { %394 = vmatpush3.bf16.msra.mxu1 %v393_v18  ;;  %v402_v41 = vpack.c.bf16 %v162_v40, %v161_v39  ;;  %v164_v43 = vld [vmem:[#allocation5 + $0x58] sm:$0xff]  ;;  %v165_v45 = vld [vmem:[#allocation5 + $0x60] sm:$0xff]  ;;  %v166_v46 = vld [vmem:[#allocation5 + $0x68] sm:$0xff] }
  0x30   :  { %395 = vmatprep.subr.bf16.mxu1 %v474_v0  ;;  %v405_v44 = vpack.c.bf16 %v164_v43, %v163_v42  ;;  %v408_v47 = vpack.c.bf16 %v166_v46, %v165_v45  ;;  %v167_v48 = vld [vmem:[#allocation5 + $0x70] sm:$0xff]  ;;  %v168_v49 = vld [vmem:[#allocation5 + $0x78] sm:$0xff]  ;;  %v258_v51 = vld [vmem:[%s578_s3] ss:$0 sm:$0xff] }
  0x31   :  { %373 = vmatpush3.bf16.msra.mxu0 %v372_v14  ;;  %v411_v50 = vpack.c.bf16 %v168_v49, %v167_v48  ;;  %v259_v58 = vld [vmem:[%s580_s5] ss:$0 sm:$0xff] }
  0x32   :  { %374 = vmatprep.subr.bf16.mxu0 %v474_v0 }
  0x33   :  { %397 = vmatpush3.bf16.msra.mxu1 %v396_v24 }
  0x34   :  { %398 = vmatprep.subr.bf16.mxu1 %v474_v0 }
  0x35   :  { %376 = vmatpush3.bf16.msra.mxu0 %v375_v21 }
  0x36   :  { %377 = vmatprep.subr.bf16.mxu0 %v474_v0 }
  0x37   :  { %400 = vmatpush3.bf16.msra.mxu1 %v399_v30 }
  0x38   :  { %401 = vmatprep.subr.bf16.mxu1 %v474_v0 }
  0x39   :  { %379 = vmatpush3.bf16.msra.mxu0 %v378_v27 }
  0x3a   :  { %380 = vmatprep.subr.bf16.mxu0 %v474_v0 }
  0x3b   :  { %403 = vmatpush3.bf16.msra.mxu1 %v402_v41 }
  0x3c   :  { %404 = vmatprep.subr.bf16.mxu1 %v474_v0 }
  0x3d   :  { %382 = vmatpush3.bf16.msra.mxu0 %v381_v31 }
  0x3e   :  { %383 = vmatprep.subr.bf16.mxu0 %v474_v0 }
  0x3f   :  { %406 = vmatpush3.bf16.msra.mxu1 %v405_v44 }
  0x40   :  { %407 = vmatprep.subr.bf16.mxu1 %v474_v0 }
  0x41   :  { %385 = vmatpush3.bf16.msra.mxu0 %v384_v34 }
  0x42   :  { %386 = vmatprep.subr.bf16.mxu0 %v474_v0 }
  0x43   :  { %409 = vmatpush3.bf16.msra.mxu1 %v408_v47 }
  0x44   :  { %410 = vmatprep.subr.bf16.mxu1 %v474_v0 }
  0x45   :  { %388 = vmatpush3.bf16.msra.mxu0 %v387_v37 }
  0x47   :  { %412 = vmatpush3.bf16.msra.mxu1 %v411_v50 }
  0x48   :  { %328 = vmatmul.mubr.f32.vlgmr.msra.gmra.mrb[0].mxu0 %v55_v38 }
 0x11b   :  { %v145_v52 = vpop.f32.mrb[0].mxu0 }
 0x11c   :  { %v146_v53 = vadd.f32 %v258_v51, %v145_v52  ;;  %v329_v54 = vpop.f32.mrb[1].mxu0 }
 0x11e   :  { %420 = vtanh.f32 %v146_v53 }
 0x128   :  { %v421_v56 = vpop.eup %420 }
 0x129   :  { %vm151_vm1 = vcmp.gt.f32.partialorder %v421_v56, %v150_v55 }
 0x12a   :  { %v152_v57 = vsel %vm151_vm1, %v421_v56, 0.0  ;;  %363 = vmatmul.mubr.msk.f32.vlgmr.msra.gmra.mrb[0].mxu1 %vm151_vm1, %v421_v56 }
 0x12b   :  { %247 = vst [vmem:[%s582_s7] sm:$0xff] %v152_v57 }
 0x1fd   :  { %v242_v59 = vpop.f32.mrb[0].mxu1 }
 0x1fe   :  { %v243_v60 = vadd.f32 %v259_v58, %v242_v59  ;;  %v364_v61 = vpop.f32.mrb[1].mxu1 }
 0x200   :  { %246 = vst [vmem:[%s581_s6] sm:$0xff] %v243_v60 }
 0x201   :  { %256 = vsyncpa [#allocation4], 1 }
 0x202   :  { %257 = vsyncpa [#allocation6], 1 }

</bundles_post_ra>
